<compile_context>
chip_gen: v7x
topology: tpu7x:2x2x1
jax: 0.10.0
libtpu: 0.0.40
codegen_flags: <defaults>
</compile_context>

<pallas_src>
import jax
import jax.numpy as jnp
from jax.experimental import pallas as pl
from jax.experimental.pallas import tpu as pltpu

_SLAB_ROWS = 136      # 8 header rows + 128 rows for the padded w2 block
_LANES = 128
_TB = 1024            # batch tile for the gridded large-B path (multiple of 8)
_GRIDLESS_MAX = 512   # batches at/below this run as a single gridless call


def mlp_kernel(x_ref, p_ref, o_ref):
    x = x_ref[...]                       # [TB, 2]

    w1r0 = p_ref[0:1, :]                 # [1, 128]  w1^T row 0 (zero padded)
    w1r1 = p_ref[1:2, :]                 # [1, 128]  w1^T row 1
    b1 = p_ref[2:3, :]                   # [1, 128]  b1 + 1.0 marker at lane 50
    w3r = p_ref[4:5, :]                  # [1, 128]  w3 row + b3 at lane 20
    w2 = p_ref[8:136, :]                 # [128,128] zero-padded w2^T (+ b2 row)

    # Layer 1 (in=2) on the VPU: two broadcast multiply-adds. Padding lanes
    # stay 0; lane 50 becomes exactly 1.0 (bias ride-along for layer 2).
    h1 = jnp.maximum(x[:, 0:1] * w1r0 + x[:, 1:2] * w1r1 + b1, 0.0)  # [TB, 128]

    # Layer 2 (50 -> 20) on the MXU as a padded 128x128 contraction; b2 is
    # folded into row 50 of w2, so no separate bias add.
    h2 = jnp.maximum(jnp.dot(h1, w2, preferred_element_type=jnp.float32), 0.0)

    # Layer 3 (out=1) on VPU + XLU: elementwise multiply, lane reduce; b3 is
    # folded via h2 lane 20 == 1.0 and w3r lane 20 == b3.
    z3 = jnp.sum(h2 * w3r, axis=-1, keepdims=True)                   # [TB, 1]

    # Sigmoid via tanh (single EUP op): sigmoid(z) = 0.5*(tanh(z/2)+1).
    o_ref[...] = 0.5 * (jnp.tanh(0.5 * z3) + 1.0)


def prepare_params(params):
    """One-time packing of PyTorch-convention params into a single padded slab."""
    w1 = params["w1"]  # [50, 2]
    b1 = params["b1"]  # [50]
    w2 = params["w2"]  # [20, 50]
    b2 = params["b2"]  # [20]
    w3 = params["w3"]  # [1, 20]
    b3 = params["b3"]  # [1]

    slab = jnp.zeros((_SLAB_ROWS, _LANES), jnp.float32)
    slab = slab.at[0:2, 0:50].set(w1.T)        # w1^T  [2, 50]
    slab = slab.at[2, 0:50].set(b1)
    slab = slab.at[2, 50].set(1.0)             # h1 lane 50 == 1 after ReLU
    slab = slab.at[4, 0:20].set(w3[0])         # w3 as a row [20]
    slab = slab.at[4, 20].set(b3[0])           # b3 rides along the lane reduce
    slab = slab.at[8:58, 0:20].set(w2.T)       # w2^T  [50, 20]
    slab = slab.at[58, 0:20].set(b2)           # b2 rides along the MXU dot
    slab = slab.at[58, 20].set(1.0)            # h2 lane 20 == 1 after ReLU
    # TODO(synk): on v6e/v7x a separate bf16 copy of the w2 block (MXU operand
    # only) would cut MXU passes at large B; kept f32 for exact 1e-5 matching.
    return slab


def _mlp_pallas(x, slab):
    """x: [B, 2] (B already padded to the required multiple)."""
    B = x.shape[0]
    out_shape = jax.ShapeDtypeStruct((B, 1), jnp.float32)

    if B <= _GRIDLESS_MAX:
        # Small batch: single invocation, everything VMEM-resident, no grid.
        vmem = pl.BlockSpec(memory_space=pltpu.VMEM)
        return pl.pallas_call(
            mlp_kernel,
            out_shape=out_shape,
            in_specs=[vmem, vmem],
            out_specs=vmem,
        )(x, slab)

    # Large batch: 1-D batch grid; slab has a constant index_map so it is
    # fetched once and stays resident; batch axis is "parallel" so v7x's two
    # TensorCores both get work.
    return pl.pallas_call(
        mlp_kernel,
        out_shape=out_shape,
        grid_spec=pltpu.PrefetchScalarGridSpec(
            num_scalar_prefetch=0,
            grid=(B // _TB,),
            in_specs=[
                pl.BlockSpec((_TB, 2), lambda i: (i, 0)),
                pl.BlockSpec((_SLAB_ROWS, _LANES), lambda i: (0, 0)),
            ],
            out_specs=pl.BlockSpec((_TB, 1), lambda i: (i, 0)),
        ),
        compiler_params=pltpu.CompilerParams(
            dimension_semantics=("parallel",)),
    )(x, slab)


@jax.jit
def net_forward(x, slab):
    """x: [B, 2] float32; slab: pre-packed [136, 128] parameter slab."""
    B = x.shape[0]
    mult = 8 if B <= _GRIDLESS_MAX else _TB
    pad = (-B) % mult
    xp = jnp.pad(x, ((0, pad), (0, 0))) if pad else x
    out = _mlp_pallas(xp, slab)
    return out[:B] if pad else out


def init_params(key):
    """Deterministic init mimicking nn.Linear default (U(-1/sqrt(fan_in), 1/sqrt(fan_in)))."""
    def linear(key, fan_in, fan_out):
        kw, kb = jax.random.split(key)
        bound = 1.0 / jnp.sqrt(float(fan_in))
        w = jax.random.uniform(kw, (fan_out, fan_in), jnp.float32, -bound, bound)
        b = jax.random.uniform(kb, (fan_out,), jnp.float32, -bound, bound)
        return w, b

    k1, k2, k3 = jax.random.split(key, 3)
    w1, b1 = linear(k1, 2, 50)
    w2, b2 = linear(k2, 50, 20)
    w3, b3 = linear(k3, 20, 1)
    return {"w1": w1, "b1": b1, "w2": w2, "b2": b2, "w3": w3, "b3": b3}


def reference_forward(x, p):
    h1 = jnp.maximum(x @ p["w1"].T + p["b1"], 0.0)
    h2 = jnp.maximum(h1 @ p["w2"].T + p["b2"], 0.0)
    z3 = h2 @ p["w3"].T + p["b3"]
    return jax.nn.sigmoid(z3)


if __name__ == "__main__":
    key = jax.random.PRNGKey(0)
    kx, kp = jax.random.split(key)
    params = init_params(kp)
    slab = prepare_params(params)                     # one-time packing, not per call
    x = jax.random.normal(kx, (8, 2), jnp.float32)    # batch=8, in_features=2

    out = jax.block_until_ready(net_forward(x, slab))
    ref = reference_forward(x, params)
    assert out.shape == (8, 1), out.shape
    assert jnp.allclose(out, ref, atol=1e-5, rtol=1e-5), "mismatch vs reference (small B)"

    # Exercise the gridded large-B path (padding + batch grid + parallel axis).
    xb = jax.random.normal(jax.random.PRNGKey(1), (2051, 2), jnp.float32)
    outb = jax.block_until_ready(net_forward(xb, slab))
    refb = reference_forward(xb, params)
    assert outb.shape == (2051, 1), outb.shape
    assert jnp.allclose(outb, refb, atol=1e-5, rtol=1e-5), "mismatch vs reference (large B)"

    print("KERNEL_OK")
</pallas_src>

<mosaic_0001>
module attributes {stable_mosaic.version = 11 : i64} {
  func.func @mlp_kernel(%arg0: memref<8x2xf32, #tpu.memory_space<vmem>>, %arg1: memref<136x128xf32, #tpu.memory_space<vmem>>, %arg2: memref<8x1xf32, #tpu.memory_space<vmem>>) attributes {dimension_semantics = [], scalar_prefetch = 0 : i64, scratch_operands = 0 : i64, tpu.core_type = #tpu.core_type<tc>} {
    %c0 = arith.constant 0 : index
    %c0_0 = arith.constant 0 : index
    %0 = vector.load %arg0[%c0, %c0_0] : memref<8x2xf32, #tpu.memory_space<vmem>>, vector<8x2xf32>
    %c0_1 = arith.constant 0 : index
    %c0_2 = arith.constant 0 : index
    %1 = vector.load %arg1[%c0_1, %c0_2] : memref<136x128xf32, #tpu.memory_space<vmem>>, vector<1x128xf32>
    %c1 = arith.constant 1 : index
    %c0_3 = arith.constant 0 : index
    %2 = vector.load %arg1[%c1, %c0_3] : memref<136x128xf32, #tpu.memory_space<vmem>>, vector<1x128xf32>
    %c2 = arith.constant 2 : index
    %c0_4 = arith.constant 0 : index
    %3 = vector.load %arg1[%c2, %c0_4] : memref<136x128xf32, #tpu.memory_space<vmem>>, vector<1x128xf32>
    %c4 = arith.constant 4 : index
    %c0_5 = arith.constant 0 : index
    %4 = vector.load %arg1[%c4, %c0_5] : memref<136x128xf32, #tpu.memory_space<vmem>>, vector<1x128xf32>
    %c8 = arith.constant 8 : index
    %c0_6 = arith.constant 0 : index
    %5 = vector.load %arg1[%c8, %c0_6] : memref<136x128xf32, #tpu.memory_space<vmem>>, vector<128x128xf32>
    %6 = vector.extract_strided_slice %0 {offsets = [0, 0], sizes = [8, 1], strides = [1, 1]} : vector<8x2xf32> to vector<8x1xf32>
    %7 = vector.broadcast %6 : vector<8x1xf32> to vector<8x128xf32>
    %8 = vector.broadcast %1 : vector<1x128xf32> to vector<8x128xf32>
    %9 = arith.mulf %7, %8 : vector<8x128xf32>
    %10 = vector.extract_strided_slice %0 {offsets = [0, 1], sizes = [8, 1], strides = [1, 1]} : vector<8x2xf32> to vector<8x1xf32>
    %11 = vector.broadcast %10 : vector<8x1xf32> to vector<8x128xf32>
    %12 = vector.broadcast %2 : vector<1x128xf32> to vector<8x128xf32>
    %13 = arith.mulf %11, %12 : vector<8x128xf32>
    %14 = arith.addf %9, %13 : vector<8x128xf32>
    %15 = vector.broadcast %3 : vector<1x128xf32> to vector<8x128xf32>
    %16 = arith.addf %14, %15 : vector<8x128xf32>
    %cst = arith.constant 0.000000e+00 : f32
    %17 = vector.broadcast %cst : f32 to vector<8x128xf32>
    %18 = arith.maximumf %16, %17 : vector<8x128xf32>
    %cst_7 = arith.constant dense<0.000000e+00> : vector<8x128xf32>
    %19 = tpu.matmul %18, %5, %cst_7 {dimension_numbers = #tpu.dot_dimension_numbers<[1], [0], [0], [1], [0, 0, 1, 1], [], []>} : vector<8x128xf32>, vector<128x128xf32>, vector<8x128xf32> -> vector<8x128xf32>
    %cst_8 = arith.constant 0.000000e+00 : f32
    %20 = vector.broadcast %cst_8 : f32 to vector<8x128xf32>
    %21 = arith.maximumf %19, %20 : vector<8x128xf32>
    %22 = vector.broadcast %4 : vector<1x128xf32> to vector<8x128xf32>
    %23 = arith.mulf %21, %22 : vector<8x128xf32>
    %cst_9 = arith.constant dense<0.000000e+00> : vector<8xf32>
    %24 = vector.multi_reduction <add>, %23, %cst_9 [1] : vector<8x128xf32> to vector<8xf32>
    %25 = vector.shape_cast %24 : vector<8xf32> to vector<8x1xf32>
    %cst_10 = arith.constant 5.000000e-01 : f32
    %26 = vector.broadcast %cst_10 : f32 to vector<8x1xf32>
    %27 = arith.mulf %26, %25 : vector<8x1xf32>
    %28 = math.tanh %27 : vector<8x1xf32>
    %cst_11 = arith.constant 1.000000e+00 : f32
    %29 = vector.broadcast %cst_11 : f32 to vector<8x1xf32>
    %30 = arith.addf %28, %29 : vector<8x1xf32>
    %cst_12 = arith.constant 5.000000e-01 : f32
    %31 = vector.broadcast %cst_12 : f32 to vector<8x1xf32>
    %32 = arith.mulf %31, %30 : vector<8x1xf32>
    %c0_13 = arith.constant 0 : index
    %c0_14 = arith.constant 0 : index
    %33 = vector.load %arg2[%c0_13, %c0_14] : memref<8x1xf32, #tpu.memory_space<vmem>>, vector<8x1xf32>
    tpu.vector_store %arg2[%c0_13, %c0_14], %32 {strides = array<i32>} : memref<8x1xf32, #tpu.memory_space<vmem>>, vector<8x1xf32>,
    return
  }
}

</mosaic_0001>

<bundles_post_ra>
// kernel: net_forward.1
= control target key start
LH: loop header
LB: loop body
LE: loop exit
PB: predicated region body
PF: predicated region fallthrough
CT: control target
= control target key end

     0   :  { %7 = vsyncpa [#allocation3], 0  ;;  %s277_s9 = smov [#allocation2]   ;;  %s318_s0 = inlined_call_operand.vmem [shape: f32[8,2], index: 0, kind: input, shape index: {}]   ;;  %s319_s1 = inlined_call_operand.hbm [shape: f32[136,128], index: 1, kind: input, shape index: {}]   ;;  %s320_s2 = inlined_call_operand.vmem [shape: f32[8,1], index: 2, kind: output, shape index: {}]  }
   0x1   :  { %s15_s10 = sshll.u32 %s277_s9, 4  ;;  %s253_s13 = scalar_lea.hbm %s319_s1, 2176  ;;  %s16_s10 = int_to_ptr.vmem [resolvable:$true] %s15_s10 }
   0x2   :  { %p254_p0 = scmp.ne.s32.totalorder %s319_s1, %s253_s13  ;;  %p257_p1 = scmp.lt.u32.totalorder %s253_s13, %s319_s1 }
   0x4   :  { %p259_p2 = pnand %p257_p1, %p254_p0 }
   0x6   :  { %262 = shalt.err (!%p259_p2)
}
   0x7   :  { %s263_s18 = scalar_lea.vmem %s16_s10, 2176  ;;  %p268_p4 = scmp.lt.s32.totalorder %s16_s10, %s16_s10 }
   0x8   :  { %p264_p3 = scmp.ne.s32.totalorder %s16_s10, %s263_s18  ;;  %p269_p5 = scmp.lt.s32.totalorder %s263_s18, %s263_s18 }
   0xa   :  { %p270_p6 = por %p269_p5, %p268_p4 }
   0xc   :  { %p271_p7 = pnand %p270_p6, %p264_p3 }
   0xe   :  { %274 = shalt.err (!%p271_p7)
}
   0xf   :  { %s278_s19 = smov 128   ;;  %s279_s20 = smov 8  }
  0x10   :  { %21 = dma.hbm_to_vmem [thread:$0]  %s319_s1, 2176, %s16_s10, [#allocation3], %s278_s19, %s278_s19, %s279_s20  }
  0x11   :  { %275 = dma.done.wait [#allocation3], 2176  }
  0x12   :  { %276 = vsyncadd [#allocation3], 4294965120  ;;  %v280_v0 = vmov 0   ;;  %v281_v1 = vmov 0.0|0.0   ;;  %v25_v2 = vld [vmem:[%s318_s0] sm:$0xff]  ;;  %v30_v3 = vld [vmem:[#allocation2 + $0x8] sm:$0xff] }
  0x13   :  { %249 = vset.pattern.permute.xlu0 %v280_v0  ;;  %217 = vmatprep.subr.bf16.mxu0 %v281_v1  ;;  %v31_v4 = vld [vmem:[#allocation2 + $0x10] sm:$0xff]  ;;  %v32_v6 = vld [vmem:[#allocation2 + $0x18] sm:$0xff]  ;;  %v33_v7 = vld [vmem:[#allocation2 + $0x20] sm:$0xff]  ;;  %v282_v11 = vmov 1   ;;  %vm283_vm0 = vmmov 0   ;;  %v284_v15 = vmov 0.0  }
  0x14   :  { %48 = vperm.xlu0 %249, %v25_v2   ;;  %v218_v5 = vpack.c.bf16 %v31_v4, %v30_v3  ;;  %v221_v8 = vpack.c.bf16 %v33_v7, %v32_v6  ;;  %v34_v9 = vld [vmem:[#allocation2 + $0x28] sm:$0xff]  ;;  %v35_v10 = vld [vmem:[#allocation2 + $0x30] sm:$0xff]  ;;  %v36_v13 = vld [vmem:[#allocation2 + $0x38] sm:$0xff]  ;;  %214 = vmatprep.mubr.msk.f32.mxu0 %vm283_vm0, %v284_v15  ;;  %vm154_vm1 = vcmask 7168  }
  0x15   :  { %v224_v12 = vpack.c.bf16 %v35_v10, %v34_v9  ;;  %v37_v14 = vld [vmem:[#allocation2 + $0x40] sm:$0xff]  ;;  %v38_v17 = vld [vmem:[#allocation2 + $0x48] sm:$0xff]  ;;  %v39_v18 = vld [vmem:[#allocation2 + $0x50] sm:$0xff] }
  0x16   :  { %219 = vmatpush3.bf16.msra.mxu0 %v218_v5  ;;  %v227_v16 = vpack.c.bf16 %v37_v14, %v36_v13  ;;  %v230_v19 = vpack.c.bf16 %v39_v18, %v38_v17  ;;  %v40_v20 = vld [vmem:[#allocation2 + $0x58] sm:$0xff]  ;;  %v41_v21 = vld [vmem:[#allocation2 + $0x60] sm:$0xff]  ;;  %v42_v23 = vld [vmem:[#allocation2 + $0x68] sm:$0xff] }
  0x17   :  { %220 = vmatprep.subr.bf16.mxu0 %v281_v1  ;;  %v233_v22 = vpack.c.bf16 %v41_v21, %v40_v20  ;;  %v43_v24 = vld [vmem:[#allocation2 + $0x70] sm:$0xff]  ;;  %v44_v26 = vld [vmem:[#allocation2 + $0x78] sm:$0xff]  ;;  %v45_v27 = vld [vmem:[#allocation2 + $0x80] sm:$0xff] }
  0x18   :  { %250 = vset.pattern.permute.xlu0 %v282_v11  ;;  %v236_v25 = vpack.c.bf16 %v43_v24, %v42_v23  ;;  %v239_v28 = vpack.c.bf16 %v45_v27, %v44_v26  ;;  %v161_v30 = vld [vmem:[#allocation2] ss:$0 sm:$0xff]  ;;  %v162_v31 = vld [vmem:[#allocation2 + $0x1] ss:$0 sm:$0xff]  ;;  %v163_v35 = vld [vmem:[#allocation2 + $0x2] ss:$0 sm:$0xff] }
  0x19   :  { %57 = vperm.xlu0 %250, %v25_v2   ;;  %v164_v40 = vld [vmem:[#allocation2 + $0x4] ss:$0 sm:$0xff] }
  0x1a   :  { %222 = vmatpush3.bf16.msra.mxu0 %v221_v8 }
  0x1b   :  { %223 = vmatprep.subr.bf16.mxu0 %v281_v1 }
  0x1e   :  { %225 = vmatpush3.bf16.msra.mxu0 %v224_v12 }
  0x1f   :  { %226 = vmatprep.subr.bf16.mxu0 %v281_v1 }
  0x22   :  { %228 = vmatpush3.bf16.msra.mxu0 %v227_v16 }
  0x23   :  { %229 = vmatprep.subr.bf16.mxu0 %v281_v1 }
  0x26   :  { %231 = vmatpush3.bf16.msra.mxu0 %v230_v19 }
  0x27   :  { %232 = vmatprep.subr.bf16.mxu0 %v281_v1 }
  0x2a   :  { %234 = vmatpush3.bf16.msra.mxu0 %v233_v22 }
  0x2b   :  { %235 = vmatprep.subr.bf16.mxu0 %v281_v1 }
  0x2e   :  { %237 = vmatpush3.bf16.msra.mxu0 %v236_v25 }
  0x2f   :  { %238 = vmatprep.subr.bf16.mxu0 %v281_v1 }
  0x32   :  { %240 = vmatpush3.bf16.msra.mxu0 %v239_v28 }
  0x93   :  { %v49_v29 = vpop.permute.xlu0 %48 }
  0x94   :  { %v55_v33 = vmul.f32 %v161_v30, %v49_v29 }
  0x98   :  { %v58_v32 = vpop.permute.xlu0 %57 }
  0x99   :  { %v64_v34 = vmul.f32 %v162_v31, %v58_v32 }
  0x9b   :  { %v65_v36 = vadd.f32 %v64_v34, %v55_v33 }
  0x9d   :  { %v70_v37 = vadd.f32 %v163_v35, %v65_v36 }
  0x9f   :  { %v71_v38 = vmax.f32 %v70_v37, 0.0 }
  0xa1   :  { %215 = vmatmul.mubr.f32.vlgmr.msra.gmra.mrb[0].mxu0 %v71_v38 }
 0x174   :  { %v138_v39 = vpop.f32.mrb[0].mxu0 }
 0x175   :  { %v142_v41 = vmax.f32 %v138_v39, 0.0  ;;  %v216_v42 = vpop.f32.mrb[1].mxu0 }
 0x177   :  { %v147_v43 = vmul.f32 %v164_v40, %v142_v41 }
 0x179   :  { %148 = vadd.xlane.f32.xlu1 %v147_v43 }
 0x206   :  { %v149_v44 = vpop.xlane.xlu1 %148 }
 0x207   :  { %v150_v45 = vmul.f32 0.5, %v149_v44 }
 0x209   :  { %251 = vtanh.f32 %v150_v45 }
 0x213   :  { %v252_v46 = vpop.eup %251 }
 0x214   :  { %v152_v47 = vadd.f32 1.0, %v252_v46 }
 0x216   :  { %v153_v48 = vmul.f32 0.5, %v152_v47 }
 0x218   :  { %155 = vst.msk [vmem:[%s320_s2] sm:$0xff] %vm154_vm1, %v153_v48 }
 0x219   :  { %160 = vsyncpa [#allocation3], 1 }

</bundles_post_ra>
